<compile_context>
chip_gen: v5e
topology: v5e:2x2
jax: 0.10.0
libtpu: 0.0.40
codegen_flags: <defaults>
</compile_context>

<pallas_src>
import jax
import jax.numpy as jnp
from jax.experimental import pallas as pl
from jax.experimental.pallas import tpu as pltpu


# ----------------------------------------------------------------------------
# Tile selection helpers
# ----------------------------------------------------------------------------
def _pick_tile(dim, candidates):
    """Largest candidate that exactly divides `dim`; otherwise the full extent."""
    for c in candidates:
        if c <= dim and dim % c == 0:
            return c
    return dim


# Descending order (review fix): biggest divisor wins, so TD is not capped at 512.
_TM_CANDIDATES = (256, 128, 64, 32, 16, 8)            # batch-row tiles (multiples of 8)
_TD_CANDIDATES = (4096, 2048, 1024, 512, 256, 128)    # lane tiles (multiples of 128)

# Max tile config (TM=256, TD=4096, f32, 3 big arrays double-buffered) ~ 24 MiB,
# so 32 MiB scoped VMEM is safe on every chip incl. v7x (64 MiB physical).
_VMEM_LIMIT = 32 * 1024 * 1024


def _cap_tm_for_megacore(n, tm):
    """Ensure >= 2 batch blocks when possible so the 'parallel' axis can shard
    across v7x's two TensorCores (no effect on single-TC v5e/v6e)."""
    if tm > 0 and n // tm >= 2:
        return tm
    half = (n // 2) // 8 * 8
    if half >= 8 and n % half == 0:
        return half
    return tm


# ----------------------------------------------------------------------------
# Kernel 1: forward-diffusion noising  x = x0 * sqrt(a) + e * sqrt(1 - a)
# ----------------------------------------------------------------------------
def _noising_kernel(sa_ref, s1ma_ref, x0_ref, e_ref, x_ref):
    sa = sa_ref[...]       # (TM, 1) f32 — broadcasts along the lane axis
    s1 = s1ma_ref[...]     # (TM, 1) f32
    x = x0_ref[...].astype(jnp.float32) * sa + e_ref[...].astype(jnp.float32) * s1
    x_ref[...] = x.astype(x_ref.dtype)


def _noise_inputs(x0_flat, e_flat, sqrt_a, sqrt_1ma, *, tm, td):
    n, d = x0_flat.shape
    grid = (n // tm, d // td)
    big_map = lambda i, j: (i, j)
    coef_map = lambda i, j: (i, 0)
    return pl.pallas_call(
        _noising_kernel,
        out_shape=jax.ShapeDtypeStruct((n, d), x0_flat.dtype),
        grid_spec=pltpu.PrefetchScalarGridSpec(
            num_scalar_prefetch=0,
            grid=grid,
            in_specs=[
                pl.BlockSpec((tm, 1), coef_map),   # sqrt(a)   per batch row
                pl.BlockSpec((tm, 1), coef_map),   # sqrt(1-a) per batch row
                pl.BlockSpec((tm, td), big_map),   # x0
                pl.BlockSpec((tm, td), big_map),   # e
            ],
            out_specs=pl.BlockSpec((tm, td), big_map),
        ),
        compiler_params=pltpu.CompilerParams(
            dimension_semantics=("parallel", "parallel"),
            vmem_limit_bytes=_VMEM_LIMIT,
        ),
    )(sqrt_a, sqrt_1ma, x0_flat, e_flat)


# ----------------------------------------------------------------------------
# Kernel 2: per-sample squared error  psum[n] = sum_d (e[n,d] - output[n,d])^2
# ----------------------------------------------------------------------------
def _sq_err_kernel(e_ref, yhat_ref, psum_ref, acc_ref):
    # Feature axis (grid axis 1) is the reduction axis.
    @pl.when(pl.program_id(1) == 0)
    def _():
        acc_ref[...] = jnp.zeros_like(acc_ref)

    tm, td = e_ref.shape
    d = e_ref[...].astype(jnp.float32) - yhat_ref[...].astype(jnp.float32)
    sq = d * d

    # Fold TD lanes down to 128 lanes with pure VPU adds over 128-aligned
    # lane slices (no cross-lane reduce, no relayout) — accumulate into the
    # lane-dense (TM, 128) scratch that stays resident across the grid axis.
    partial = sq[:, 0:128]
    for k in range(1, td // 128):
        partial = partial + sq[:, k * 128:(k + 1) * 128]
    acc_ref[...] += partial

    # Single cross-lane reduce + narrow output store, once per output block.
    @pl.when(pl.program_id(1) == pl.num_programs(1) - 1)
    def _():
        psum_ref[...] = jnp.sum(acc_ref[...], axis=1, keepdims=True)


def _per_sample_sq_err(e_flat, out_flat, *, tm, td):
    n, d = e_flat.shape
    grid = (n // tm, d // td)
    psum = pl.pallas_call(
        _sq_err_kernel,
        out_shape=jax.ShapeDtypeStruct((n, 1), jnp.float32),
        grid_spec=pltpu.PrefetchScalarGridSpec(
            num_scalar_prefetch=0,
            grid=grid,
            in_specs=[
                pl.BlockSpec((tm, td), lambda i, j: (i, j)),   # e
                pl.BlockSpec((tm, td), lambda i, j: (i, j)),   # model output
            ],
            out_specs=pl.BlockSpec((tm, 1), lambda i, j: (i, 0)),  # resident over j
            scratch_shapes=[pltpu.VMEM((tm, 128), jnp.float32)],
        ),
        compiler_params=pltpu.CompilerParams(
            dimension_semantics=("parallel", "arbitrary"),
            vmem_limit_bytes=_VMEM_LIMIT,
        ),
    )(e_flat, out_flat)
    return psum[:, 0]   # (N,) per-sample sums over dims (1,2,3)


# ----------------------------------------------------------------------------
# Diff_Loss.forward equivalent
# ----------------------------------------------------------------------------
def diff_loss_forward(model_fn, x0, t, e, b, keepdim=False):
    """Pallas-backed equivalent of Diff_Loss.forward: returns (loss, output)."""
    n, c, h, w = x0.shape
    d = c * h * w
    d_pad = ((d + 127) // 128) * 128   # lane-dense padding (zeros → exact sq. error)

    # Tiny O(T) schedule math + O(N) gather: plain JAX (no benefit from a kernel).
    a = jnp.cumprod(1.0 - b.astype(jnp.float32))[t]               # (N,)
    sqrt_a = jnp.sqrt(a).reshape(n, 1).astype(jnp.float32)
    sqrt_1ma = jnp.sqrt(1.0 - a).reshape(n, 1).astype(jnp.float32)

    tm = _pick_tile(n, _TM_CANDIDATES)
    td = _pick_tile(d_pad, _TD_CANDIDATES)
    tm_loss = _cap_tm_for_megacore(n, tm)   # >= 2 batch blocks on v7x when N allows

    x0_flat = x0.reshape(n, d)
    e_flat = e.reshape(n, d)
    if d_pad != d:
        pad = ((0, 0), (0, d_pad - d))
        x0_flat = jnp.pad(x0_flat, pad)
        e_flat = jnp.pad(e_flat, pad)

    # x = x0 * sqrt(a) + e * sqrt(1 - a)   (Pallas kernel 1)
    x_flat = _noise_inputs(x0_flat, e_flat, sqrt_a, sqrt_1ma, tm=tm, td=td)
    x = x_flat[:, :d].reshape(n, c, h, w)

    # TODO(synk): arbitrary diffusion model — runs as ordinary JAX, not a Pallas kernel.
    output = model_fn(x, t.astype(jnp.float32))

    out_flat = output.reshape(n, d)
    if d_pad != d:
        out_flat = jnp.pad(out_flat, ((0, 0), (0, d_pad - d)))

    # per-sample sum((e - output)^2) over dims (1,2,3)   (Pallas kernel 2)
    per_sample = _per_sample_sq_err(e_flat, out_flat, tm=tm_loss, td=td)

    if keepdim:
        return per_sample, output
    return jnp.mean(per_sample), output


# ----------------------------------------------------------------------------
# Stand-in model + pure-JAX reference for validation
# ----------------------------------------------------------------------------
def _toy_model(x, t_float):
    # Deterministic stand-in "noise predictor": nonlinearity + timestep-dependent scale.
    scale = 1.0 + 1e-3 * t_float.reshape(-1, 1, 1, 1)
    return jnp.tanh(x) * scale


def _reference(model_fn, x0, t, e, b):
    a = jnp.cumprod(1.0 - b)[t].reshape(-1, 1, 1, 1)
    x = x0 * jnp.sqrt(a) + e * jnp.sqrt(1.0 - a)
    output = model_fn(x, t.astype(jnp.float32))
    loss = jnp.mean(jnp.sum((e - output) ** 2, axis=(1, 2, 3)))
    return loss, output


if __name__ == "__main__":
    N, C, H, W = 2, 4, 16, 16
    num_steps = 10

    key = jax.random.PRNGKey(0)
    k0, k1 = jax.random.split(key)
    x0 = jax.random.normal(k0, (N, C, H, W), dtype=jnp.float32)
    e = jax.random.normal(k1, (N, C, H, W), dtype=jnp.float32)
    t = jnp.array([3, 7], dtype=jnp.int32)
    b = jnp.linspace(1e-4, 2e-2, num_steps, dtype=jnp.float32)

    loss, output = diff_loss_forward(_toy_model, x0, t, e, b)
    loss = jax.block_until_ready(loss)
    output = jax.block_until_ready(output)

    ref_loss, ref_output = _reference(_toy_model, x0, t, e, b)
    assert jnp.allclose(loss, ref_loss, rtol=1e-5, atol=1e-5), (loss, ref_loss)
    assert jnp.allclose(output, ref_output, rtol=1e-5, atol=1e-5)

    print("KERNEL_OK")
</pallas_src>

<mosaic_0001>
module attributes {stable_mosaic.version = 11 : i64} {
  func.func @_noising_kernel(%arg0: i32, %arg1: i32, %arg2: memref<2x1xf32, #tpu.memory_space<vmem>>, %arg3: memref<2x1xf32, #tpu.memory_space<vmem>>, %arg4: memref<2x1024xf32, #tpu.memory_space<vmem>>, %arg5: memref<2x1024xf32, #tpu.memory_space<vmem>>, %arg6: memref<2x1024xf32, #tpu.memory_space<vmem>>) attributes {dimension_semantics = [#tpu.dimension_semantics<parallel>, #tpu.dimension_semantics<parallel>], iteration_bounds = array<i64: 1, 1>, scalar_prefetch = 0 : i64, scratch_operands = 0 : i64, tpu.core_type = #tpu.core_type<tc>, window_params = [{transform_indices = @transform_0, window_bounds = array<i64: 2, 1>}, {transform_indices = @transform_1, window_bounds = array<i64: 2, 1>}, {transform_indices = @transform_2, window_bounds = array<i64: 2, 1024>}, {transform_indices = @transform_3, window_bounds = array<i64: 2, 1024>}, {transform_indices = @transform_4, window_bounds = array<i64: 2, 1024>}]} {
    %c0 = arith.constant 0 : index
    %c0_0 = arith.constant 0 : index
    %0 = vector.load %arg2[%c0, %c0_0] : memref<2x1xf32, #tpu.memory_space<vmem>>, vector<2x1xf32>
    %c0_1 = arith.constant 0 : index
    %c0_2 = arith.constant 0 : index
    %1 = vector.load %arg3[%c0_1, %c0_2] : memref<2x1xf32, #tpu.memory_space<vmem>>, vector<2x1xf32>
    %c0_3 = arith.constant 0 : index
    %c0_4 = arith.constant 0 : index
    %2 = vector.load %arg4[%c0_3, %c0_4] : memref<2x1024xf32, #tpu.memory_space<vmem>>, vector<2x1024xf32>
    %3 = vector.broadcast %0 : vector<2x1xf32> to vector<2x1024xf32>
    %4 = arith.mulf %2, %3 : vector<2x1024xf32>
    %c0_5 = arith.constant 0 : index
    %c0_6 = arith.constant 0 : index
    %5 = vector.load %arg5[%c0_5, %c0_6] : memref<2x1024xf32, #tpu.memory_space<vmem>>, vector<2x1024xf32>
    %6 = vector.broadcast %1 : vector<2x1xf32> to vector<2x1024xf32>
    %7 = arith.mulf %5, %6 : vector<2x1024xf32>
    %8 = arith.addf %4, %7 : vector<2x1024xf32>
    %c0_7 = arith.constant 0 : index
    %c0_8 = arith.constant 0 : index
    %9 = vector.load %arg6[%c0_7, %c0_8] : memref<2x1024xf32, #tpu.memory_space<vmem>>, vector<2x1024xf32>
    tpu.vector_store %arg6[%c0_7, %c0_8], %8 {strides = array<i32>} : memref<2x1024xf32, #tpu.memory_space<vmem>>, vector<2x1024xf32>,
    return
  }
  func.func @transform_0(%arg0: i32, %arg1: i32) -> (i32, i32) {
    %c0_i32 = arith.constant 0 : i32
    %c0_i32_0 = arith.constant 0 : i32
    return %arg0, %c0_i32 : i32, i32
  }
  func.func @transform_1(%arg0: i32, %arg1: i32) -> (i32, i32) {
    %c0_i32 = arith.constant 0 : i32
    %c0_i32_0 = arith.constant 0 : i32
    return %arg0, %c0_i32 : i32, i32
  }
  func.func @transform_2(%arg0: i32, %arg1: i32) -> (i32, i32) {
    %c0_i32 = arith.constant 0 : i32
    return %arg0, %arg1 : i32, i32
  }
  func.func @transform_3(%arg0: i32, %arg1: i32) -> (i32, i32) {
    %c0_i32 = arith.constant 0 : i32
    return %arg0, %arg1 : i32, i32
  }
  func.func @transform_4(%arg0: i32, %arg1: i32) -> (i32, i32) {
    %c0_i32 = arith.constant 0 : i32
    return %arg0, %arg1 : i32, i32
  }
}

</mosaic_0001>

<bundles_post_ra>
// kernel: tpu_custom_call.1
= control target key start
LH: loop header
LB: loop body
LE: loop exit
PB: predicated region body
PF: predicated region fallthrough
CT: control target
= control target key end

     0   :  { %9 = vsyncpa [#allocation3], 0  ;;  %s225_s0 = inlined_call_operand.vmem [shape: f32[2,1], index: 0, kind: input, shape index: {}]   ;;  %s226_s1 = inlined_call_operand.vmem [shape: f32[2,1], index: 1, kind: input, shape index: {}]   ;;  %s227_s2 = inlined_call_operand.hbm [shape: f32[2,1024], index: 2, kind: input, shape index: {}]   ;;  %s228_s3 = inlined_call_operand.hbm [shape: f32[2,1024], index: 3, kind: input, shape index: {}]   ;;  %s229_s4 = inlined_call_operand.hbm [shape: f32[2,1024], index: 4, kind: output, shape index: {}]  }
   0x1   :  { %10 = vsyncpa [#allocation6], 0 }
   0x2   :  { %11 = vsyncpa [#allocation4], 0  ;;  %s21_s17 = sshll.u32 %s227_s2, 4  ;;  %s180_s18 = smov [#allocation2]   ;;  %s22_s17 = int_to_ptr.hbm [resolvable:$true] %s21_s17 }
   0x3   :  { %s23_s19 = sshll.u32 %s180_s18, 4  ;;  %s32_s22 = sshll.u32 %s228_s3, 4  ;;  %s24_s19 = int_to_ptr.vmem [resolvable:$true] %s23_s19  ;;  %s33_s22 = int_to_ptr.hbm [resolvable:$true] %s32_s22 }
   0x4   :  { %26 = dma.hbm_to_vmem [thread:$0]  %s22_s17, 256, %s24_s19, [#allocation3]  }
   0x5   :  { %s181_s23 = smov [#allocation5]  }
   0x6   :  { %s34_s24 = sshll.u32 %s181_s23, 4  ;;  %s35_s24 = int_to_ptr.vmem [resolvable:$true] %s34_s24 }
   0x7   :  { %37 = dma.hbm_to_vmem [thread:$0]  %s33_s22, 256, %s35_s24, [#allocation6]  }
   0x8   :  { %174 = dma.done.wait [#allocation3], 256  }
   0x9   :  { %175 = vsyncadd [#allocation3], 4294967040 }
   0xa   :  { %176 = dma.done.wait [#allocation6], 256  }
   0xb   :  { %177 = vsyncadd [#allocation6], 4294967040  ;;  %v182_v0 = vmov 0   ;;  %v46_v1 = vld [vmem:[%s225_s0] sm:$0x3]  ;;  %v49_v9 = vld [vmem:[#allocation2 + $0x8] sm:$0xff] }
   0xc   :  { %101 = vset.pattern.permute.xlu0 %v182_v0  ;;  %v47_v2 = vld [vmem:[%s226_s1] sm:$0x3]  ;;  %v183_v3 = vmov 269488144   ;;  %v61_v10 = vld [vmem:[#allocation5] sm:$0xff]  ;;  %v62_v11 = vld [vmem:[#allocation5 + $0x8] sm:$0xff] }
   0xd   :  { %52 = vperm.xlu0 %101, %v46_v1   ;;  %v55_v4 = vunpack.c.l.s4 %v183_v3  ;;  %v48_v7 = vld [vmem:[#allocation2] sm:$0xff]  ;;  %s184_s0 = smov [#allocation7]   ;;  %s85_s29 = sshll.u32 %s229_s4, 4  ;;  %s86_s29 = int_to_ptr.hbm [resolvable:$true] %s85_s29 }
   0xe   :  { %s83_s3 = sshll.u32 %s184_s0, 4  ;;  %s84_s3 = int_to_ptr.vmem [resolvable:$true] %s83_s3 }
   0xf   :  { %v56_v6 = vunpack.c.0.s8 %v55_v4 }
  0x15   :  { %65 = vperm.xlu0 %101, %v47_v2  }
  0x7f   :  { %v53_v5 = vpop.permute.xlu0 %52 }
  0x80   :  { %v57_v8 = vperm.slane %v53_v5, %v56_v6 }
  0x82   :  { %v59_v14 = vmul.f32 %v57_v8, %v48_v7  ;;  %v60_v15 = vmul.f32 %v57_v8, %v49_v9 }
  0x87   :  { %v66_v12 = vpop.permute.xlu0 %65 }
  0x88   :  { %v70_v13 = vperm.slane %v66_v12, %v56_v6 }
  0x8a   :  { %v72_v16 = vmul.f32 %v70_v13, %v61_v10  ;;  %v73_v17 = vmul.f32 %v70_v13, %v62_v11 }
  0x8c   :  { %v74_v18 = vadd.f32 %v72_v16, %v59_v14  ;;  %v75_v19 = vadd.f32 %v73_v17, %v60_v15 }
  0x8e   :  { %76 = vst [vmem:[#allocation7] sm:$0xff] %v74_v18 }
  0x8f   :  { %77 = vst [vmem:[#allocation7 + $0x8] sm:$0xff] %v75_v19 }
  0x90   :  { %88 = dma.vmem_to_hbm [thread:$0]  %s84_s3, 256, %s86_s29, [#allocation4]  }
  0x91   :  { %178 = dma.done.wait [#allocation4], 256  }
  0x92   :  { %179 = vsyncadd [#allocation4], 4294967040 }
  0x93   :  { %93 = vsyncpa [#allocation3], 1 }
  0x94   :  { %94 = vsyncpa [#allocation6], 1 }
  0x95   :  { %95 = vsyncpa [#allocation4], 1 }

</bundles_post_ra>
